<compile_context>
chip_gen: v6e
topology: v6e:2x2x1
jax: 0.10.0
libtpu: 0.0.40
codegen_flags: <defaults>
</compile_context>

<pallas_src>
import functools

import jax
import jax.numpy as jnp
from jax.experimental import pallas as pl
from jax.experimental.pallas import tpu as pltpu

LANE = 128


def _round_up(x, m):
    return ((x + m - 1) // m) * m


# ----------------------------------------------------------------------------
# Pallas kernel: in-kernel pad/one-hot -> (Linear -> ReLU)* -> fused f32 head
# ----------------------------------------------------------------------------
def make_encoder_kernel(num_mlp_layers, conditional, num_labels):
    def kernel(*refs):
        x_ref = refs[0]
        c_ref = refs[1] if conditional else None
        first_w = 2 if conditional else 1
        out_ref = refs[-2]
        xs_ref = refs[-1]                       # VMEM scratch (TB, Din_p) bf16

        tb, d_in = x_ref.shape
        din_p = xs_ref.shape[1]

        # Build the lane-padded input slab in VMEM:
        #   columns [d_in, d_in+num_labels) <- one_hot(c), everything else 0,
        #   then columns [0, d_in) <- x.
        if conditional:
            col = jax.lax.broadcasted_iota(jnp.int32, (tb, din_p), 1)
            tgt = c_ref[...] + d_in                              # (TB, 1) int32
            xs_ref[...] = jnp.where(col == tgt, 1.0, 0.0).astype(jnp.bfloat16)
        else:
            xs_ref[...] = jnp.zeros((tb, din_p), jnp.bfloat16)
        xs_ref[:, :d_in] = x_ref[...].astype(jnp.bfloat16)
        h = xs_ref[...]                                          # bf16 (TB, Din_p)

        idx = first_w
        for _ in range(num_mlp_layers):
            w_ref, b_ref = refs[idx], refs[idx + 1]
            idx += 2
            y = jnp.dot(h, w_ref[...],
                        preferred_element_type=jnp.float32) + b_ref[...]
            h = jnp.maximum(y.astype(jnp.bfloat16), 0.0)         # bf16 ReLU

        wh_ref, bh_ref = refs[idx], refs[idx + 1]                # fused f32 head
        out_ref[...] = (jnp.dot(h.astype(jnp.float32), wh_ref[...],
                                preferred_element_type=jnp.float32)
                        + bh_ref[...]).astype(out_ref.dtype)
    return kernel


# ----------------------------------------------------------------------------
# Parameters (deterministic init, mimicking PyTorch Linear's U(-1/sqrt(in), .))
# Weights stored as [in, out] so the kernel computes y = x @ W + b.
# ----------------------------------------------------------------------------
def init_linear(key, in_size, out_size):
    kw, kb = jax.random.split(key)
    bound = 1.0 / jnp.sqrt(jnp.float32(in_size))
    w = jax.random.uniform(kw, (in_size, out_size), jnp.float32, -bound, bound)
    b = jax.random.uniform(kb, (1, out_size), jnp.float32, -bound, bound)
    return w, b


def make_encoder_params(key, layer_sizes, latent_size, conditional, num_labels):
    sizes = list(layer_sizes)
    if conditional:
        sizes[0] += num_labels
    keys = jax.random.split(key, len(sizes) + 1)
    params = {"mlp": []}
    for i, (in_s, out_s) in enumerate(zip(sizes[:-1], sizes[1:])):
        params["mlp"].append(init_linear(keys[i], in_s, out_s))
    params["means"] = init_linear(keys[-2], sizes[-1], latent_size)
    params["log_var"] = init_linear(keys[-1], sizes[-1], latent_size)
    return params


def _pad2d(a, rows, cols):
    return jnp.pad(a, ((0, rows - a.shape[0]), (0, cols - a.shape[1])))


def pack_encoder_params(params):
    """Pad feature dims to 128-lane multiples.  MLP weights -> bf16; the fused
    (means | log_var) head stays f32 for precision (log_var feeds exp())."""
    packed = []
    for w, b in params["mlp"]:
        kp = _round_up(w.shape[0], LANE)
        np_ = _round_up(w.shape[1], LANE)
        packed.append((_pad2d(w, kp, np_).astype(jnp.bfloat16),
                       _pad2d(b, 1, np_)))
    wm, bm = params["means"]
    wv, bv = params["log_var"]
    wh = jnp.concatenate([wm, wv], axis=1)
    bh = jnp.concatenate([bm, bv], axis=1)
    kp = _round_up(wh.shape[0], LANE)
    np_ = _round_up(wh.shape[1], LANE)
    packed.append((_pad2d(wh, kp, np_), _pad2d(bh, 1, np_)))     # f32 head
    return packed


# ----------------------------------------------------------------------------
# Tiling policy & spec helpers
# ----------------------------------------------------------------------------
def _pick_batch_tile(B):
    # >=16 rows for full bf16 vreg packing; 128-row multiples keep MXU rows
    # busy and output stores unmasked.  For mid-size batches aim for >=2 grid
    # steps (v7x has 2 TensorCores); cap at 512 rows for very large batches
    # (v6e/v5e measured sweet spot, amortizes per-grid-step overhead).
    if B <= 64:
        return _round_up(B, 16)
    if B <= 256:
        return 128
    if B <= 1024:
        return _round_up(-(-B // 2), 128)
    return 512


def _resident_spec(shape, single_buffer):
    # Constant index_map: the block never changes, so a single VMEM buffer is
    # enough.  pipeline_mode=Buffered(1) halves the resident-weight footprint.
    if single_buffer:
        return pl.BlockSpec(shape, lambda i: (0, 0),
                            pipeline_mode=pl.Buffered(1))
    return pl.BlockSpec(shape, lambda i: (0, 0))


# ----------------------------------------------------------------------------
# Wrapper
# ----------------------------------------------------------------------------
@functools.partial(jax.jit,
                   static_argnames=("latent_size", "conditional", "num_labels",
                                    "single_buffer_weights"))
def encoder_forward(packed_params, x, c, latent_size, conditional, num_labels,
                    single_buffer_weights=True):
    B, D = x.shape
    num_mlp = len(packed_params) - 1
    Din_p = packed_params[0][0].shape[0]
    Lh_p = packed_params[-1][0].shape[1]

    TB = _pick_batch_tile(B)
    B_pad = _round_up(B, TB)

    # Only batch padding is done host-side; feature pad + one-hot happen
    # inside the kernel (no padded slab ever touches HBM).
    x_b = x if B_pad == B else jnp.pad(x, ((0, B_pad - B), (0, 0)))

    in_specs = [pl.BlockSpec((TB, D), lambda i: (i, 0))]
    flat_args = [x_b]
    if conditional:
        c_b = c.reshape(-1, 1).astype(jnp.int32)
        if B_pad != B:
            c_b = jnp.pad(c_b, ((0, B_pad - B), (0, 0)))
        in_specs.append(pl.BlockSpec((TB, 1), lambda i: (i, 0)))
        flat_args.append(c_b)

    weight_bytes = 0
    max_n = 0
    flops = 0
    for w, b in packed_params:
        in_specs.append(_resident_spec(w.shape, single_buffer_weights))
        in_specs.append(_resident_spec(b.shape, single_buffer_weights))
        flat_args.extend([w, b])
        weight_bytes += w.size * w.dtype.itemsize + b.size * b.dtype.itemsize
        max_n = max(max_n, w.shape[1])
        flops += 2 * B_pad * w.shape[0] * w.shape[1]

    out_spec = pl.BlockSpec((TB, Lh_p), lambda i: (i, 0))
    out_shape = jax.ShapeDtypeStruct((B_pad, Lh_p), jnp.float32)

    bytes_accessed = (x_b.size * x_b.dtype.itemsize
                      + (B_pad * 4 if conditional else 0)
                      + weight_bytes
                      + B_pad * Lh_p * 4)

    # Honest VMEM estimate: weights x buffer_count, double-buffered x/out
    # tiles, in-kernel scratch slab, plus activation headroom.
    wbuf = 1 if single_buffer_weights else 2
    est_vmem = (wbuf * weight_bytes
                + 2 * TB * D * 4
                + (2 * TB * 4 if conditional else 0)
                + 2 * TB * Lh_p * 4
                + TB * Din_p * 2
                + 4 * TB * max_n * 4)
    # Cap below v7x's 64 MiB physical VMEM (v5e/v6e have 128 MiB headroom).
    vmem_limit = int(max(32 << 20, min(48 << 20, 2 * est_vmem)))

    out = pl.pallas_call(
        make_encoder_kernel(num_mlp, conditional, num_labels),
        out_shape=out_shape,
        grid=(B_pad // TB,),
        in_specs=in_specs,
        out_specs=out_spec,
        scratch_shapes=[pltpu.VMEM((TB, Din_p), jnp.bfloat16)],
        compiler_params=pltpu.CompilerParams(
            dimension_semantics=("parallel",),
            vmem_limit_bytes=vmem_limit),
        cost_estimate=pl.CostEstimate(flops=int(flops), transcendentals=0,
                                      bytes_accessed=int(bytes_accessed)),
    )(*flat_args)

    means = out[:B, :latent_size]
    log_vars = out[:B, latent_size:2 * latent_size]
    return means, log_vars


# ----------------------------------------------------------------------------
# Pure-JAX reference (f32, unpadded) for a sanity check
# ----------------------------------------------------------------------------
def idx2onehot(idx, n):
    return jax.nn.one_hot(idx.reshape(-1), n, dtype=jnp.float32)


def encoder_reference(params, x, c, conditional, num_labels):
    if conditional:
        x = jnp.concatenate((x, idx2onehot(c, num_labels)), axis=-1)
    h = x
    for w, b in params["mlp"]:
        h = jnp.maximum(h @ w + b, 0.0)
    wm, bm = params["means"]
    wv, bv = params["log_var"]
    return h @ wm + bm, h @ wv + bv


if __name__ == "__main__":
    # Small, encoder-consistent shapes.
    layer_sizes = [32, 64, 32]   # input dim 32, two MLP layers
    latent_size = 8
    conditional = True
    num_labels = 10              # matches the module's hardcoded n=10 one-hot
    batch = 8

    key = jax.random.PRNGKey(0)
    k_params, k_x, k_c = jax.random.split(key, 3)

    params = make_encoder_params(k_params, layer_sizes, latent_size,
                                 conditional, num_labels)
    packed = pack_encoder_params(params)

    x = jax.random.normal(k_x, (batch, layer_sizes[0]), jnp.float32)
    c = jax.random.randint(k_c, (batch,), 0, num_labels, jnp.int32)
    assert int(jnp.max(c)) < num_labels   # mirrors idx2onehot's assert

    def run(single_buffer):
        m, lv = encoder_forward(packed, x, c, latent_size, conditional,
                                num_labels, single_buffer_weights=single_buffer)
        return jax.block_until_ready(m), jax.block_until_ready(lv)

    try:
        means, log_vars = run(True)
    except Exception:
        # Fallback if this JAX build rejects pipeline_mode / Buffered(1).
        means, log_vars = run(False)

    ref_means, ref_logvars = encoder_reference(params, x, c, conditional,
                                               num_labels)
    assert means.shape == (batch, latent_size)
    assert log_vars.shape == (batch, latent_size)
    # bf16 MLP matmuls with f32 accumulation (head is f32) vs f32 reference.
    assert jnp.allclose(means, ref_means, atol=3e-2, rtol=3e-2)
    assert jnp.allclose(log_vars, ref_logvars, atol=3e-2, rtol=3e-2)

    print("KERNEL_OK")
</pallas_src>

<mosaic_0001>
module attributes {stable_mosaic.version = 11 : i64} {
  func.func @kernel(%arg0: i32, %arg1: memref<16x32xf32, #tpu.memory_space<vmem>>, %arg2: memref<16x1xi32, #tpu.memory_space<vmem>>, %arg3: memref<128x128xbf16, #tpu.memory_space<vmem>>, %arg4: memref<1x128xf32, #tpu.memory_space<vmem>>, %arg5: memref<128x128xbf16, #tpu.memory_space<vmem>>, %arg6: memref<1x128xf32, #tpu.memory_space<vmem>>, %arg7: memref<128x128xf32, #tpu.memory_space<vmem>>, %arg8: memref<1x128xf32, #tpu.memory_space<vmem>>, %arg9: memref<16x128xf32, #tpu.memory_space<vmem>>, %arg10: memref<16x128xbf16, #tpu.memory_space<vmem>>) attributes {dimension_semantics = [#tpu.dimension_semantics<parallel>], iteration_bounds = array<i64: 1>, scalar_prefetch = 0 : i64, scratch_operands = 1 : i64, tpu.core_type = #tpu.core_type<tc>, window_params = [{transform_indices = @transform_0, window_bounds = array<i64: 16, 32>}, {transform_indices = @transform_1, window_bounds = array<i64: 16, 1>}, {pipeline_mode = #tpu.pipeline_mode<synchronous>, transform_indices = @transform_2, window_bounds = array<i64: 128, 128>}, {pipeline_mode = #tpu.pipeline_mode<synchronous>, transform_indices = @transform_3, window_bounds = array<i64: 1, 128>}, {pipeline_mode = #tpu.pipeline_mode<synchronous>, transform_indices = @transform_4, window_bounds = array<i64: 128, 128>}, {pipeline_mode = #tpu.pipeline_mode<synchronous>, transform_indices = @transform_5, window_bounds = array<i64: 1, 128>}, {pipeline_mode = #tpu.pipeline_mode<synchronous>, transform_indices = @transform_6, window_bounds = array<i64: 128, 128>}, {pipeline_mode = #tpu.pipeline_mode<synchronous>, transform_indices = @transform_7, window_bounds = array<i64: 1, 128>}, {transform_indices = @transform_8, window_bounds = array<i64: 16, 128>}]} {
    %0 = tpu.iota {dimensions = array<i32: 1>} : vector<16x128xi32>
    %c0 = arith.constant 0 : index
    %c0_0 = arith.constant 0 : index
    %1 = vector.load %arg2[%c0, %c0_0] : memref<16x1xi32, #tpu.memory_space<vmem>>, vector<16x1xi32>
    %c32_i32 = arith.constant 32 : i32
    %2 = vector.broadcast %c32_i32 : i32 to vector<16x1xi32>
    %3 = arith.addi %1, %2 : vector<16x1xi32>
    %4 = vector.broadcast %3 : vector<16x1xi32> to vector<16x128xi32>
    %5 = arith.cmpi eq, %0, %4 : vector<16x128xi32>
    %cst = arith.constant 1.000000e+00 : f32
    %cst_1 = arith.constant 0.000000e+00 : f32
    %6 = vector.broadcast %cst : f32 to vector<16x128xf32>
    %7 = vector.broadcast %cst_1 : f32 to vector<16x128xf32>
    %8 = arith.select %5, %6, %7 : vector<16x128xi1>, vector<16x128xf32>
    %9 = arith.truncf %8 : vector<16x128xf32> to vector<16x128xbf16>
    %c0_2 = arith.constant 0 : index
    %c0_3 = arith.constant 0 : index
    %10 = vector.load %arg10[%c0_2, %c0_3] : memref<16x128xbf16, #tpu.memory_space<vmem>>, vector<16x128xbf16>
    tpu.vector_store %arg10[%c0_2, %c0_3], %9 {strides = array<i32>} : memref<16x128xbf16, #tpu.memory_space<vmem>>, vector<16x128xbf16>,
    %c0_4 = arith.constant 0 : index
    %c0_5 = arith.constant 0 : index
    %11 = vector.load %arg1[%c0_4, %c0_5] : memref<16x32xf32, #tpu.memory_space<vmem>>, vector<16x32xf32>
    %12 = arith.truncf %11 : vector<16x32xf32> to vector<16x32xbf16>
    %c0_6 = arith.constant 0 : index
    %c0_7 = arith.constant 0 : index
    %13 = vector.load %arg10[%c0_6, %c0_7] : memref<16x128xbf16, #tpu.memory_space<vmem>>, vector<16x32xbf16>
    tpu.vector_store %arg10[%c0_6, %c0_7], %12 {strides = array<i32>} : memref<16x128xbf16, #tpu.memory_space<vmem>>, vector<16x32xbf16>,
    %c0_8 = arith.constant 0 : index
    %c0_9 = arith.constant 0 : index
    %14 = vector.load %arg10[%c0_8, %c0_9] : memref<16x128xbf16, #tpu.memory_space<vmem>>, vector<16x128xbf16>
    %c0_10 = arith.constant 0 : index
    %c0_11 = arith.constant 0 : index
    %15 = vector.load %arg3[%c0_10, %c0_11] : memref<128x128xbf16, #tpu.memory_space<vmem>>, vector<128x128xbf16>
    %cst_12 = arith.constant dense<0.000000e+00> : vector<16x128xf32>
    %16 = tpu.matmul %14, %15, %cst_12 {dimension_numbers = #tpu.dot_dimension_numbers<[1], [0], [0], [1], [0, 0, 1, 1], [], []>} : vector<16x128xbf16>, vector<128x128xbf16>, vector<16x128xf32> -> vector<16x128xf32>
    %c0_13 = arith.constant 0 : index
    %c0_14 = arith.constant 0 : index
    %17 = vector.load %arg4[%c0_13, %c0_14] : memref<1x128xf32, #tpu.memory_space<vmem>>, vector<1x128xf32>
    %18 = vector.broadcast %17 : vector<1x128xf32> to vector<16x128xf32>
    %19 = arith.addf %16, %18 : vector<16x128xf32>
    %20 = arith.truncf %19 : vector<16x128xf32> to vector<16x128xbf16>
    %cst_15 = arith.constant 0.000000e+00 : bf16
    %21 = vector.broadcast %cst_15 : bf16 to vector<16x128xbf16>
    %22 = arith.maximumf %20, %21 : vector<16x128xbf16>
    %c0_16 = arith.constant 0 : index
    %c0_17 = arith.constant 0 : index
    %23 = vector.load %arg5[%c0_16, %c0_17] : memref<128x128xbf16, #tpu.memory_space<vmem>>, vector<128x128xbf16>
    %cst_18 = arith.constant dense<0.000000e+00> : vector<16x128xf32>
    %24 = tpu.matmul %22, %23, %cst_18 {dimension_numbers = #tpu.dot_dimension_numbers<[1], [0], [0], [1], [0, 0, 1, 1], [], []>} : vector<16x128xbf16>, vector<128x128xbf16>, vector<16x128xf32> -> vector<16x128xf32>
    %c0_19 = arith.constant 0 : index
    %c0_20 = arith.constant 0 : index
    %25 = vector.load %arg6[%c0_19, %c0_20] : memref<1x128xf32, #tpu.memory_space<vmem>>, vector<1x128xf32>
    %26 = vector.broadcast %25 : vector<1x128xf32> to vector<16x128xf32>
    %27 = arith.addf %24, %26 : vector<16x128xf32>
    %28 = arith.truncf %27 : vector<16x128xf32> to vector<16x128xbf16>
    %cst_21 = arith.constant 0.000000e+00 : bf16
    %29 = vector.broadcast %cst_21 : bf16 to vector<16x128xbf16>
    %30 = arith.maximumf %28, %29 : vector<16x128xbf16>
    %31 = arith.extf %30 : vector<16x128xbf16> to vector<16x128xf32>
    %c0_22 = arith.constant 0 : index
    %c0_23 = arith.constant 0 : index
    %32 = vector.load %arg7[%c0_22, %c0_23] : memref<128x128xf32, #tpu.memory_space<vmem>>, vector<128x128xf32>
    %cst_24 = arith.constant dense<0.000000e+00> : vector<16x128xf32>
    %33 = tpu.matmul %31, %32, %cst_24 {dimension_numbers = #tpu.dot_dimension_numbers<[1], [0], [0], [1], [0, 0, 1, 1], [], []>} : vector<16x128xf32>, vector<128x128xf32>, vector<16x128xf32> -> vector<16x128xf32>
    %c0_25 = arith.constant 0 : index
    %c0_26 = arith.constant 0 : index
    %34 = vector.load %arg8[%c0_25, %c0_26] : memref<1x128xf32, #tpu.memory_space<vmem>>, vector<1x128xf32>
    %35 = vector.broadcast %34 : vector<1x128xf32> to vector<16x128xf32>
    %36 = arith.addf %33, %35 : vector<16x128xf32>
    %c0_27 = arith.constant 0 : index
    %c0_28 = arith.constant 0 : index
    %37 = vector.load %arg9[%c0_27, %c0_28] : memref<16x128xf32, #tpu.memory_space<vmem>>, vector<16x128xf32>
    tpu.vector_store %arg9[%c0_27, %c0_28], %36 {strides = array<i32>} : memref<16x128xf32, #tpu.memory_space<vmem>>, vector<16x128xf32>,
    return
  }
  func.func @transform_0(%arg0: i32) -> (i32, i32) {
    %c0_i32 = arith.constant 0 : i32
    %c0_i32_0 = arith.constant 0 : i32
    return %arg0, %c0_i32 : i32, i32
  }
  func.func @transform_1(%arg0: i32) -> (i32, i32) {
    %c0_i32 = arith.constant 0 : i32
    %c0_i32_0 = arith.constant 0 : i32
    return %arg0, %c0_i32 : i32, i32
  }
  func.func @transform_2(%arg0: i32) -> (i32, i32) {
    %c0_i32 = arith.constant 0 : i32
    %c0_i32_0 = arith.constant 0 : i32
    %c0_i32_1 = arith.constant 0 : i32
    return %c0_i32, %c0_i32_0 : i32, i32
  }
  func.func @transform_3(%arg0: i32) -> (i32, i32) {
    %c0_i32 = arith.constant 0 : i32
    %c0_i32_0 = arith.constant 0 : i32
    %c0_i32_1 = arith.constant 0 : i32
    return %c0_i32, %c0_i32_0 : i32, i32
  }
  func.func @transform_4(%arg0: i32) -> (i32, i32) {
    %c0_i32 = arith.constant 0 : i32
    %c0_i32_0 = arith.constant 0 : i32
    %c0_i32_1 = arith.constant 0 : i32
    return %c0_i32, %c0_i32_0 : i32, i32
  }
  func.func @transform_5(%arg0: i32) -> (i32, i32) {
    %c0_i32 = arith.constant 0 : i32
    %c0_i32_0 = arith.constant 0 : i32
    %c0_i32_1 = arith.constant 0 : i32
    return %c0_i32, %c0_i32_0 : i32, i32
  }
  func.func @transform_6(%arg0: i32) -> (i32, i32) {
    %c0_i32 = arith.constant 0 : i32
    %c0_i32_0 = arith.constant 0 : i32
    %c0_i32_1 = arith.constant 0 : i32
    return %c0_i32, %c0_i32_0 : i32, i32
  }
  func.func @transform_7(%arg0: i32) -> (i32, i32) {
    %c0_i32 = arith.constant 0 : i32
    %c0_i32_0 = arith.constant 0 : i32
    %c0_i32_1 = arith.constant 0 : i32
    return %c0_i32, %c0_i32_0 : i32, i32
  }
  func.func @transform_8(%arg0: i32) -> (i32, i32) {
    %c0_i32 = arith.constant 0 : i32
    %c0_i32_0 = arith.constant 0 : i32
    return %arg0, %c0_i32 : i32, i32
  }
}

module attributes {stable_mosaic.version = 11 : i64} {
  func.func @kernel(%arg0: i32, %arg1: memref<16x32xf32, #tpu.memory_space<vmem>>, %arg2: memref<16x1xi32, #tpu.memory_space<vmem>>, %arg3: memref<128x128xbf16, #tpu.memory_space<vmem>>, %arg4: memref<1x128xf32, #tpu.memory_space<vmem>>, %arg5: memref<128x128xbf16, #tpu.memory_space<vmem>>, %arg6: memref<1x128xf32, #tpu.memory_space<vmem>>, %arg7: memref<128x128xf32, #tpu.memory_space<vmem>>, %arg8: memref<1x128xf32, #tpu.memory_space<vmem>>, %arg9: memref<16x128xf32, #tpu.memory_space<vmem>>, %arg10: memref<16x128xbf16, #tpu.memory_space<vmem>>) attributes {dimension_semantics = [#tpu.dimension_semantics<parallel>], iteration_bounds = array<i64: 1>, scalar_prefetch = 0 : i64, scratch_operands = 1 : i64, tpu.core_type = #tpu.core_type<tc>, window_params = [{transform_indices = @transform_0, window_bounds = array<i64: 16, 32>}, {transform_indices = @transform_1, window_bounds = array<i64: 16, 1>}, {pipeline_mode = #tpu.pipeline_mode<synchronous>, transform_indices = @transform_2, window_bounds = array<i64: 128, 128>}, {pipeline_mode = #tpu.pipeline_mode<synchronous>, transform_indices = @transform_3, window_bounds = array<i64: 1, 128>}, {pipeline_mode = #tpu.pipeline_mode<synchronous>, transform_indices = @transform_4, window_bounds = array<i64: 128, 128>}, {pipeline_mode = #tpu.pipeline_mode<synchronous>, transform_indices = @transform_5, window_bounds = array<i64: 1, 128>}, {pipeline_mode = #tpu.pipeline_mode<synchronous>, transform_indices = @transform_6, window_bounds = array<i64: 128, 128>}, {pipeline_mode = #tpu.pipeline_mode<synchronous>, transform_indices = @transform_7, window_bounds = array<i64: 1, 128>}, {transform_indices = @transform_8, window_bounds = array<i64: 16, 128>}]} {
    %0 = tpu.iota {dimensions = array<i32: 1>} : vector<16x128xi32>
    %c0 = arith.constant 0 : index
    %c0_0 = arith.constant 0 : index
    %1 = vector.load %arg2[%c0, %c0_0] : memref<16x1xi32, #tpu.memory_space<vmem>>, vector<16x1xi32>
    %c32_i32 = arith.constant 32 : i32
    %2 = vector.broadcast %c32_i32 : i32 to vector<16x1xi32>
    %3 = arith.addi %1, %2 : vector<16x1xi32>
    %4 = vector.broadcast %3 : vector<16x1xi32> to vector<16x128xi32>
    %5 = arith.cmpi eq, %0, %4 : vector<16x128xi32>
    %cst = arith.constant 1.000000e+00 : f32
    %cst_1 = arith.constant 0.000000e+00 : f32
    %6 = vector.broadcast %cst : f32 to vector<16x128xf32>
    %7 = vector.broadcast %cst_1 : f32 to vector<16x128xf32>
    %8 = arith.select %5, %6, %7 : vector<16x128xi1>, vector<16x128xf32>
    %9 = arith.truncf %8 : vector<16x128xf32> to vector<16x128xbf16>
    %c0_2 = arith.constant 0 : index
    %c0_3 = arith.constant 0 : index
    %10 = vector.load %arg10[%c0_2, %c0_3] : memref<16x128xbf16, #tpu.memory_space<vmem>>, vector<16x128xbf16>
    tpu.vector_store %arg10[%c0_2, %c0_3], %9 {strides = array<i32>} : memref<16x128xbf16, #tpu.memory_space<vmem>>, vector<16x128xbf16>,
    %c0_4 = arith.constant 0 : index
    %c0_5 = arith.constant 0 : index
    %11 = vector.load %arg1[%c0_4, %c0_5] : memref<16x32xf32, #tpu.memory_space<vmem>>, vector<16x32xf32>
    %12 = arith.truncf %11 : vector<16x32xf32> to vector<16x32xbf16>
    %c0_6 = arith.constant 0 : index
    %c0_7 = arith.constant 0 : index
    %13 = vector.load %arg10[%c0_6, %c0_7] : memref<16x128xbf16, #tpu.memory_space<vmem>>, vector<16x32xbf16>
    tpu.vector_store %arg10[%c0_6, %c0_7], %12 {strides = array<i32>} : memref<16x128xbf16, #tpu.memory_space<vmem>>, vector<16x32xbf16>,
    %c0_8 = arith.constant 0 : index
    %c0_9 = arith.constant 0 : index
    %14 = vector.load %arg10[%c0_8, %c0_9] : memref<16x128xbf16, #tpu.memory_space<vmem>>, vector<16x128xbf16>
    %c0_10 = arith.constant 0 : index
    %c0_11 = arith.constant 0 : index
    %15 = vector.load %arg3[%c0_10, %c0_11] : memref<128x128xbf16, #tpu.memory_space<vmem>>, vector<128x128xbf16>
    %cst_12 = arith.constant dense<0.000000e+00> : vector<16x128xf32>
    %16 = tpu.matmul %14, %15, %cst_12 {dimension_numbers = #tpu.dot_dimension_numbers<[1], [0], [0], [1], [0, 0, 1, 1], [], []>} : vector<16x128xbf16>, vector<128x128xbf16>, vector<16x128xf32> -> vector<16x128xf32>
    %c0_13 = arith.constant 0 : index
    %c0_14 = arith.constant 0 : index
    %17 = vector.load %arg4[%c0_13, %c0_14] : memref<1x128xf32, #tpu.memory_space<vmem>>, vector<1x128xf32>
    %18 = vector.broadcast %17 : vector<1x128xf32> to vector<16x128xf32>
    %19 = arith.addf %16, %18 : vector<16x128xf32>
    %20 = arith.truncf %19 : vector<16x128xf32> to vector<16x128xbf16>
    %cst_15 = arith.constant 0.000000e+00 : bf16
    %21 = vector.broadcast %cst_15 : bf16 to vector<16x128xbf16>
    %22 = arith.maximumf %20, %21 : vector<16x128xbf16>
    %c0_16 = arith.constant 0 : index
    %c0_17 = arith.constant 0 : index
    %23 = vector.load %arg5[%c0_16, %c0_17] : memref<128x128xbf16, #tpu.memory_space<vmem>>, vector<128x128xbf16>
    %cst_18 = arith.constant dense<0.000000e+00> : vector<16x128xf32>
    %24 = tpu.matmul %22, %23, %cst_18 {dimension_numbers = #tpu.dot_dimension_numbers<[1], [0], [0], [1], [0, 0, 1, 1], [], []>} : vector<16x128xbf16>, vector<128x128xbf16>, vector<16x128xf32> -> vector<16x128xf32>
    %c0_19 = arith.constant 0 : index
    %c0_20 = arith.constant 0 : index
    %25 = vector.load %arg6[%c0_19, %c0_20] : memref<1x128xf32, #tpu.memory_space<vmem>>, vector<1x128xf32>
    %26 = vector.broadcast %25 : vector<1x128xf32> to vector<16x128xf32>
    %27 = arith.addf %24, %26 : vector<16x128xf32>
    %28 = arith.truncf %27 : vector<16x128xf32> to vector<16x128xbf16>
    %cst_21 = arith.constant 0.000000e+00 : bf16
    %29 = vector.broadcast %cst_21 : bf16 to vector<16x128xbf16>
    %30 = arith.maximumf %28, %29 : vector<16x128xbf16>
    %31 = arith.extf %30 : vector<16x128xbf16> to vector<16x128xf32>
    %c0_22 = arith.constant 0 : index
    %c0_23 = arith.constant 0 : index
    %32 = vector.load %arg7[%c0_22, %c0_23] : memref<128x128xf32, #tpu.memory_space<vmem>>, vector<128x128xf32>
    %cst_24 = arith.constant dense<0.000000e+00> : vector<16x128xf32>
    %33 = tpu.matmul %31, %32, %cst_24 {dimension_numbers = #tpu.dot_dimension_numbers<[1], [0], [0], [1], [0, 0, 1, 1], [], []>} : vector<16x128xf32>, vector<128x128xf32>, vector<16x128xf32> -> vector<16x128xf32>
    %c0_25 = arith.constant 0 : index
    %c0_26 = arith.constant 0 : index
    %34 = vector.load %arg8[%c0_25, %c0_26] : memref<1x128xf32, #tpu.memory_space<vmem>>, vector<1x128xf32>
    %35 = vector.broadcast %34 : vector<1x128xf32> to vector<16x128xf32>
    %36 = arith.addf %33, %35 : vector<16x128xf32>
    %c0_27 = arith.constant 0 : index
    %c0_28 = arith.constant 0 : index
    %37 = vector.load %arg9[%c0_27, %c0_28] : memref<16x128xf32, #tpu.memory_space<vmem>>, vector<16x128xf32>
    tpu.vector_store %arg9[%c0_27, %c0_28], %36 {strides = array<i32>} : memref<16x128xf32, #tpu.memory_space<vmem>>, vector<16x128xf32>,
    return
  }
  func.func @transform_0(%arg0: i32) -> (i32, i32) {
    %c0_i32 = arith.constant 0 : i32
    %c0_i32_0 = arith.constant 0 : i32
    return %arg0, %c0_i32 : i32, i32
  }
  func.func @transform_1(%arg0: i32) -> (i32, i32) {
    %c0_i32 = arith.constant 0 : i32
    %c0_i32_0 = arith.constant 0 : i32
    return %arg0, %c0_i32 : i32, i32
  }
  func.func @transform_2(%arg0: i32) -> (i32, i32) {
    %c0_i32 = arith.constant 0 : i32
    %c0_i32_0 = arith.constant 0 : i32
    %c0_i32_1 = arith.constant 0 : i32
    return %c0_i32, %c0_i32_0 : i32, i32
  }
  func.func @transform_3(%arg0: i32) -> (i32, i32) {
    %c0_i32 = arith.constant 0 : i32
    %c0_i32_0 = arith.constant 0 : i32
    %c0_i32_1 = arith.constant 0 : i32
    return %c0_i32, %c0_i32_0 : i32, i32
  }
  func.func @transform_4(%arg0: i32) -> (i32, i32) {
    %c0_i32 = arith.constant 0 : i32
    %c0_i32_0 = arith.constant 0 : i32
    %c0_i32_1 = arith.constant 0 : i32
    return %c0_i32, %c0_i32_0 : i32, i32
  }
  func.func @transform_5(%arg0: i32) -> (i32, i32) {
    %c0_i32 = arith.constant 0 : i32
    %c0_i32_0 = arith.constant 0 : i32
    %c0_i32_1 = arith.constant 0 : i32
    return %c0_i32, %c0_i32_0 : i32, i32
  }
  func.func @transform_6(%arg0: i32) -> (i32, i32) {
    %c0_i32 = arith.constant 0 : i32
    %c0_i32_0 = arith.constant 0 : i32
    %c0_i32_1 = arith.constant 0 : i32
    return %c0_i32, %c0_i32_0 : i32, i32
  }
  func.func @transform_7(%arg0: i32) -> (i32, i32) {
    %c0_i32 = arith.constant 0 : i32
    %c0_i32_0 = arith.constant 0 : i32
    %c0_i32_1 = arith.constant 0 : i32
    return %c0_i32, %c0_i32_0 : i32, i32
  }
  func.func @transform_8(%arg0: i32) -> (i32, i32) {
    %c0_i32 = arith.constant 0 : i32
    %c0_i32_0 = arith.constant 0 : i32
    return %arg0, %c0_i32 : i32, i32
  }
}

</mosaic_0001>

<bundles_post_ra>
// kernel: encoder_forward.1
= control target key start
LH: loop header
LB: loop body
LE: loop exit
PB: predicated region body
PF: predicated region fallthrough
CT: control target
= control target key end

     0   :  { %13 = vsyncpa [#allocation4], 0  ;;  %s821_s0 = inlined_call_operand.vmem [shape: f32[16,32], index: 0, kind: input, shape index: {}]   ;;  %s822_s1 = inlined_call_operand.vmem [shape: s32[16,1], index: 1, kind: input, shape index: {}]   ;;  %s823_s2 = inlined_call_operand.hbm [shape: bf16[128,128], index: 2, kind: input, shape index: {}]   ;;  %s824_s3 = inlined_call_operand.hbm [shape: f32[1,128], index: 3, kind: input, shape index: {}]   ;;  %s825_s4 = inlined_call_operand.vmem [shape: bf16[128,128], index: 4, kind: input, shape index: {}]   ;;  %s826_s5 = inlined_call_operand.vmem [shape: f32[1,128], index: 5, kind: input, shape index: {}]   ;;  %s827_s6 = inlined_call_operand.hbm [shape: f32[128,128], index: 6, kind: input, shape index: {}]   ;;  %s828_s7 = inlined_call_operand.vmem [shape: f32[1,128], index: 7, kind: input, shape index: {}]   ;;  %s829_s8 = inlined_call_operand.vmem [shape: f32[16,128], index: 8, kind: output, shape index: {}]  }
   0x1   :  { %14 = vsyncpa [#allocation6], 0  ;;  %s686_s27 = smov [#allocation5]   ;;  %s687_s29 = smov [#allocation3]  }
   0x2   :  { %s37_s28 = sshll.u32 %s686_s27, 4  ;;  %s24_s30 = sshll.u32 %s687_s29, 4  ;;  %s38_s28 = int_to_ptr.vmem [resolvable:$true] %s37_s28  ;;  %s25_s30 = int_to_ptr.vmem [resolvable:$true] %s24_s30 }
   0x3   :  { %s630_s9 = scalar_lea.vmem %s38_s28, 16  ;;  %s634_s10 = scalar_lea.vmem %s38_s28, 32 }
   0x4   :  { %p631_p0 = scmp.ne.s32.totalorder %s38_s28, %s630_s9  ;;  %p635_p1 = scmp.lt.s32.totalorder %s38_s28, %s38_s28 }
   0x5   :  { %p636_p2 = scmp.lt.s32.totalorder %s634_s10, %s630_s9 }
   0x7   :  { %p637_p3 = por %p636_p2, %p635_p1 }
   0x9   :  { %p638_p4 = pnand %p637_p3, %p631_p0 }
   0xb   :  { %641 = shalt.err (!%p638_p4)
}
   0xc   :  { %40 = dma.hbm_to_vmem [thread:$0]  %s824_s3, 16, %s38_s28, [#allocation6]  }
   0xd   :  { %s650_s13 = scalar_lea.vmem %s25_s30, 1024  ;;  %p655_p6 = scmp.lt.s32.totalorder %s25_s30, %s25_s30 }
   0xe   :  { %p651_p5 = scmp.ne.s32.totalorder %s25_s30, %s650_s13  ;;  %p656_p7 = scmp.lt.s32.totalorder %s650_s13, %s650_s13 }
  0x10   :  { %p657_p8 = por %p656_p7, %p655_p6 }
  0x12   :  { %p658_p9 = pnand %p657_p8, %p651_p5 }
  0x14   :  { %661 = shalt.err (!%p658_p9)
}
  0x15   :  { %s688_s14 = smov 64   ;;  %s689_s15 = smov 4  }
  0x16   :  { %30 = dma.hbm_to_vmem [thread:$0]  %s823_s2, 1024, %s25_s30, [#allocation4], %s688_s14, %s688_s14, %s689_s15  }
  0x17   :  { %s690_s18 = smov [#allocation7]  }
  0x18   :  { %s50_s19 = sshll.u32 %s690_s18, 4  ;;  %s51_s19 = int_to_ptr.vmem [resolvable:$true] %s50_s19 }
  0x19   :  { %s670_s20 = scalar_lea.vmem %s51_s19, 2048  ;;  %p675_p11 = scmp.lt.s32.totalorder %s51_s19, %s51_s19 }
  0x1a   :  { %p671_p10 = scmp.ne.s32.totalorder %s51_s19, %s670_s20  ;;  %p676_p12 = scmp.lt.s32.totalorder %s670_s20, %s670_s20 }
  0x1c   :  { %p677_p13 = por %p676_p12, %p675_p11 }
  0x1e   :  { %p678_p0 = pnand %p677_p13, %p671_p10 }
  0x20   :  { %681 = shalt.err (!%p678_p0)
}
  0x21   :  { %s691_s3 = smov 128   ;;  %s692_s21 = smov 8  }
  0x22   :  { %56 = dma.hbm_to_vmem [thread:$0]  %s827_s6, 2048, %s51_s19, [#allocation6], %s691_s3, %s691_s3, %s692_s21  }
  0x23   :  { %682 = dma.done.wait [#allocation4], 1024  }
  0x24   :  { %683 = vsyncadd [#allocation4], 4294966272 }
  0x25   :  { %684 = dma.done.wait [#allocation6], 2064  }
  0x26   :  { %685 = vsyncadd [#allocation6], 4294965232  ;;  %v693_v0 = vmov 0   ;;  %v694_v1 = vmov 0.0   ;;  %v71_v2 = vld [vmem:[%s822_s1] sm:$0xff]  ;;  %v72_v3 = vld [vmem:[%s822_s1 + $0x8] sm:$0xff]  ;;  %v69_v19 = vlaneseq }
  0x27   :  { %604 = vset.pattern.permute.xlu0 %v693_v0  ;;  %519 = vmatprep.subr.bf16.mxu0 %v694_v1  ;;  %v73_v4 = vadd.s32 32, %v71_v2  ;;  %v605_v5 = vld [vmem:[#allocation3 + $0x38] sm:$0xff]   ;;  %v74_v6 = vadd.s32 32, %v72_v3  ;;  %v606_v7 = vld [vmem:[#allocation3 + $0x30] sm:$0xff]   ;;  %v607_v8 = vld [vmem:[#allocation3 + $0x28] sm:$0xff]   ;;  %vm695_vm0 = vmmov 0  }
  0x28   :  { %539 = vmatprep.subr.bf16.mxu1 %v694_v1  ;;  %520 = vmatpush3.bf16.msra.mxu0 %v605_v5  ;;  %v608_v9 = vld [vmem:[#allocation3 + $0x20] sm:$0xff]   ;;  %v609_v10 = vld [vmem:[#allocation3 + $0x18] sm:$0xff]   ;;  %v614_v11 = vld [vmem:[%s825_s4 + $0x38] sm:$0xff]   ;;  %v70_v20 = vand.u32 127, %v69_v19  ;;  %vm105_vm3 = vcmask 257024  }
  0x29   :  { %76 = vperm.xlu0 %604, %v73_v4   ;;  %521 = vmatprep.subr.bf16.mxu0 %v694_v1  ;;  %v610_v12 = vld [vmem:[#allocation3 + $0x10] sm:$0xff]   ;;  %v615_v13 = vld [vmem:[%s825_s4 + $0x30] sm:$0xff]   ;;  %v616_v15 = vld [vmem:[%s825_s4 + $0x28] sm:$0xff]  }
  0x2a   :  { %535 = vmatprep.mubr.msk.bf16.mxu0 %vm695_vm0, %v694_v1  ;;  %555 = vmatprep.mubr.msk.bf16.mxu1 %vm695_vm0, %v694_v1  ;;  %v611_v14 = vld [vmem:[#allocation3 + $0x8] sm:$0xff]   ;;  %v612_v16 = vld [vmem:[#allocation3] sm:$0xff]   ;;  %v617_v17 = vld [vmem:[%s825_s4 + $0x20] sm:$0xff]  }
  0x2b   :  { %540 = vmatpush3.bf16.msra.mxu1 %v614_v11  ;;  %v618_v18 = vld [vmem:[%s825_s4 + $0x18] sm:$0xff]   ;;  %v95_v22 = vld [vmem:[%s821_s0] sm:$0xff]  ;;  %v96_v23 = vld [vmem:[%s821_s0 + $0x8] sm:$0xff] }
  0x2c   :  { %522 = vmatpush3.bf16.msra.mxu0 %v606_v7  ;;  %541 = vmatprep.subr.bf16.mxu1 %v694_v1  ;;  %v478_v26 = vpack.c.bf16 %v95_v22, %v95_v22  ;;  %v479_v27 = vpack.c.bf16 %v96_v23, %v96_v23  ;;  %v619_v31 = vld [vmem:[%s825_s4 + $0x10] sm:$0xff]   ;;  %v620_v32 = vld [vmem:[%s825_s4 + $0x8] sm:$0xff]   ;;  %v621_v33 = vld [vmem:[%s825_s4] sm:$0xff]  }
  0x2d   :  { %79 = vperm.xlu0 %604, %v74_v6   ;;  %523 = vmatprep.subr.bf16.mxu0 %v694_v1  ;;  %v361_v34 = vld [vmem:[#allocation7 + $0x78] sm:$0xff]  ;;  %v360_v35 = vld [vmem:[#allocation7 + $0x70] sm:$0xff]  ;;  %v359_v36 = vld [vmem:[#allocation7 + $0x68] sm:$0xff] }
  0x2e   :  { %v358_v37 = vld [vmem:[#allocation7 + $0x60] sm:$0xff]  ;;  %v357_v38 = vld [vmem:[#allocation7 + $0x58] sm:$0xff]  ;;  %v356_v39 = vld [vmem:[#allocation7 + $0x50] sm:$0xff] }
  0x2f   :  { %542 = vmatpush3.bf16.msra.mxu1 %v615_v13  ;;  %v355_v40 = vld [vmem:[#allocation7 + $0x48] sm:$0xff]  ;;  %v354_v41 = vld [vmem:[#allocation7 + $0x40] sm:$0xff]  ;;  %v353_v42 = vld [vmem:[#allocation7 + $0x38] sm:$0xff] }
  0x30   :  { %524 = vmatpush3.bf16.msra.mxu0 %v607_v8  ;;  %543 = vmatprep.subr.bf16.mxu1 %v694_v1  ;;  %v456_v44 = vld [vmem:[#allocation5] ss:$0 sm:$0xff]  ;;  %v352_v52 = vld [vmem:[#allocation7 + $0x30] sm:$0xff]  ;;  %v351_v53 = vld [vmem:[#allocation7 + $0x28] sm:$0xff] }
  0x31   :  { %525 = vmatprep.subr.bf16.mxu0 %v694_v1  ;;  %v350_v54 = vld [vmem:[#allocation7 + $0x20] sm:$0xff]  ;;  %v349_v55 = vld [vmem:[#allocation7 + $0x18] sm:$0xff]  ;;  %v348_v56 = vld [vmem:[#allocation7 + $0x10] sm:$0xff] }
  0x32   :  { %v347_v57 = vld [vmem:[#allocation7 + $0x8] sm:$0xff]  ;;  %v346_v58 = vld [vmem:[#allocation7] sm:$0xff]  ;;  %v466_v60 = vld [vmem:[%s826_s5] ss:$0 sm:$0xff] }
  0x33   :  { %544 = vmatpush3.bf16.msra.mxu1 %v616_v15  ;;  %v475_v7 = vld [vmem:[%s828_s7] ss:$0 sm:$0xff] }
  0x34   :  { %526 = vmatpush3.bf16.msra.mxu0 %v608_v9  ;;  %545 = vmatprep.subr.bf16.mxu1 %v694_v1 }
  0x35   :  { %527 = vmatprep.subr.bf16.mxu0 %v694_v1 }
  0x37   :  { %546 = vmatpush3.bf16.msra.mxu1 %v617_v17 }
  0x38   :  { %528 = vmatpush3.bf16.msra.mxu0 %v609_v10  ;;  %547 = vmatprep.subr.bf16.mxu1 %v694_v1 }
  0x39   :  { %529 = vmatprep.subr.bf16.mxu0 %v694_v1 }
  0x3b   :  { %548 = vmatpush3.bf16.msra.mxu1 %v618_v18 }
  0x3c   :  { %530 = vmatpush3.bf16.msra.mxu0 %v610_v12  ;;  %549 = vmatprep.subr.bf16.mxu1 %v694_v1 }
  0x3d   :  { %531 = vmatprep.subr.bf16.mxu0 %v694_v1 }
  0x3f   :  { %550 = vmatpush3.bf16.msra.mxu1 %v619_v31 }
  0x40   :  { %532 = vmatpush3.bf16.msra.mxu0 %v611_v14  ;;  %551 = vmatprep.subr.bf16.mxu1 %v694_v1 }
  0x41   :  { %533 = vmatprep.subr.bf16.mxu0 %v694_v1 }
  0x43   :  { %552 = vmatpush3.bf16.msra.mxu1 %v620_v32 }
  0x44   :  { %534 = vmatpush3.bf16.msra.mxu0 %v612_v16  ;;  %553 = vmatprep.subr.bf16.mxu1 %v694_v1 }
  0x45   :  { %559 = vmatprep.subr.mxu0 %v361_v34 }
  0x47   :  { %554 = vmatpush3.bf16.msra.mxu1 %v621_v33 }
  0xa4   :  { %v77_v21 = vpop.permute.xlu0 %76 }
  0xa5   :  { %vm81_vm1 = vcmp.eq.s32.totalorder %v70_v20, %v77_v21 }
  0xa6   :  { %v83_v25 = vsel %vm81_vm1, 1.0, %v694_v1 }
  0xa8   :  { %v80_v24 = vpop.permute.xlu0 %79 }
  0xa9   :  { %vm82_vm2 = vcmp.eq.s32.totalorder %v70_v20, %v80_v24 }
  0xaa   :  { %v84_v28 = vsel %vm82_vm2, 1.0, %v694_v1 }
  0xab   :  { %v481_v29 = vpack.c.bf16 %v84_v28, %v83_v25 }
  0xad   :  { %482 = vst [vmem:[#allocation2] sm:$0xff] %v481_v29  }
  0xae   :  { %106 = vst.msk [vmem:[#allocation2] sm:$0xf] %vm105_vm3, %v478_v26  ;;  %107 = vst.msk [vmem:[#allocation2 + $0x4] sm:$0xf] %vm105_vm3, %v479_v27 }
  0xb5   :  { %v613_v30 = vld [vmem:[#allocation2] sm:$0xff]  }
  0xb6   :  { %536 = vmatmul.mubr.bf16.vlgmr.msra.gmra.mxu0 %v613_v30 }
  0xb7   :  { %560 = vmatpush3.msra.mxu0 %v361_v34 }
  0xb8   :  { %561 = vmatprep.subr.mxu0 %v360_v35 }
  0xb9   :  { %562 = vmatpush3.msra.mxu0 %v360_v35 }
  0xba   :  { %563 = vmatprep.subr.mxu0 %v359_v36 }
  0xbb   :  { %564 = vmatpush3.msra.mxu0 %v359_v36 }
  0xbc   :  { %565 = vmatprep.subr.mxu0 %v358_v37 }
  0xbd   :  { %566 = vmatpush3.msra.mxu0 %v358_v37 }
  0xbe   :  { %567 = vmatprep.subr.mxu0 %v357_v38 }
  0xbf   :  { %568 = vmatpush3.msra.mxu0 %v357_v38 }
  0xc0   :  { %569 = vmatprep.subr.mxu0 %v356_v39 }
  0xc1   :  { %570 = vmatpush3.msra.mxu0 %v356_v39 }
  0xc2   :  { %571 = vmatprep.subr.mxu0 %v355_v40 }
  0xc3   :  { %572 = vmatpush3.msra.mxu0 %v355_v40 }
  0xc4   :  { %573 = vmatprep.subr.mxu0 %v354_v41 }
  0xc5   :  { %574 = vmatpush3.msra.mxu0 %v354_v41 }
  0xc6   :  { %575 = vmatprep.subr.mxu0 %v353_v42 }
  0xc7   :  { %576 = vmatpush3.msra.mxu0 %v353_v42 }
  0xc8   :  { %577 = vmatprep.subr.mxu0 %v352_v52 }
  0xc9   :  { %578 = vmatpush3.msra.mxu0 %v352_v52 }
  0xca   :  { %579 = vmatprep.subr.mxu0 %v351_v53 }
  0xcb   :  { %580 = vmatpush3.msra.mxu0 %v351_v53 }
  0xcc   :  { %581 = vmatprep.subr.mxu0 %v350_v54 }
  0xcd   :  { %582 = vmatpush3.msra.mxu0 %v350_v54 }
  0xce   :  { %583 = vmatprep.subr.mxu0 %v349_v55 }
  0xcf   :  { %584 = vmatpush3.msra.mxu0 %v349_v55 }
  0xd0   :  { %585 = vmatprep.subr.mxu0 %v348_v56 }
  0xd1   :  { %586 = vmatpush3.msra.mxu0 %v348_v56 }
  0xd2   :  { %587 = vmatprep.subr.mxu0 %v347_v57 }
  0xd3   :  { %588 = vmatpush3.msra.mxu0 %v347_v57 }
  0xd4   :  { %589 = vmatprep.subr.mxu0 %v346_v58 }
  0xd5   :  { %590 = vmatpush3.msra.mxu0 %v346_v58 }
 0x176   :  { %v221_v43 = vpop.f32.mrf.mxu0 }
 0x177   :  { %v222_v47 = vadd.f32 %v456_v44, %v221_v43 }
 0x178   :  { %v537_v45 = vpop.f32.mrf.mxu0 }
 0x17a   :  { %v224_v46 = vpop.f32.mrf.mxu0 }
 0x17b   :  { %v225_v48 = vadd.f32 %v456_v44, %v224_v46 }
 0x17c   :  { %v538_v49 = vpop.f32.mrf.mxu0 }
 0x17d   :  { %v228_v50 = vpack.c.bf16 %v225_v48, %v222_v47 }
 0x17f   :  { %v229_v51 = vmax.bf16 %v693_v0, %v228_v50 }
 0x181   :  { %556 = vmatmul.mubr.bf16.vlgmr.msra.gmra.mxu1 %v229_v51 }
 0x241   :  { %v335_v59 = vpop.f32.mrf.mxu1 }
 0x242   :  { %v336_v63 = vadd.f32 %v466_v60, %v335_v59 }
 0x243   :  { %v557_v61 = vpop.f32.mrf.mxu1 }
 0x245   :  { %v338_v62 = vpop.f32.mrf.mxu1 }
 0x246   :  { %v339_v1 = vadd.f32 %v466_v60, %v338_v62 }
 0x247   :  { %v558_v2 = vpop.f32.mrf.mxu1 }
 0x248   :  { %v342_v3 = vpack.c.bf16 %v339_v1, %v336_v63 }
 0x24a   :  { %v343_v4 = vmax.bf16 %v693_v0, %v342_v3 }
 0x24c   :  { %v345_v5 = vunpack.c.h.bf16 %v343_v4  ;;  %v344_v6 = vunpack.c.l.bf16 %v343_v4 }
 0x24e   :  { %591 = vmatprep.mubr.f32.mxu0 %v344_v6 }
 0x24f   :  { %592 = vmatmul.mubr.f32.vlgmr.msra.gmra.mxu0 %v345_v5 }
 0x30f   :  { %v593_v8 = vpop.f32.mrf.mxu0 }
 0x310   :  { %v441_v9 = vadd.f32 %v593_v8, %v475_v7 }
 0x311   :  { %v435_v10 = vpop.f32.mrf.mxu0 }
 0x312   :  { %445 = vst [vmem:[%s829_s8 + $0x8] sm:$0xff] %v441_v9  ;;  %v436_v11 = vadd.f32 %v475_v7, %v435_v10 }
 0x314   :  { %444 = vst [vmem:[%s829_s8] sm:$0xff] %v436_v11 }
 0x315   :  { %450 = vsyncpa [#allocation4], 1 }
 0x316   :  { %451 = vsyncpa [#allocation6], 1 }

// kernel: encoder_forward.1
= control target key start
LH: loop header
LB: loop body
LE: loop exit
PB: predicated region body
PF: predicated region fallthrough
CT: control target
= control target key end

     0   :  { %13 = vsyncpa [#allocation4], 0  ;;  %s821_s0 = inlined_call_operand.vmem [shape: f32[16,32], index: 0, kind: input, shape index: {}]   ;;  %s822_s1 = inlined_call_operand.vmem [shape: s32[16,1], index: 1, kind: input, shape index: {}]   ;;  %s823_s2 = inlined_call_operand.hbm [shape: bf16[128,128], index: 2, kind: input, shape index: {}]   ;;  %s824_s3 = inlined_call_operand.hbm [shape: f32[1,128], index: 3, kind: input, shape index: {}]   ;;  %s825_s4 = inlined_call_operand.vmem [shape: bf16[128,128], index: 4, kind: input, shape index: {}]   ;;  %s826_s5 = inlined_call_operand.vmem [shape: f32[1,128], index: 5, kind: input, shape index: {}]   ;;  %s827_s6 = inlined_call_operand.hbm [shape: f32[128,128], index: 6, kind: input, shape index: {}]   ;;  %s828_s7 = inlined_call_operand.vmem [shape: f32[1,128], index: 7, kind: input, shape index: {}]   ;;  %s829_s8 = inlined_call_operand.vmem [shape: f32[16,128], index: 8, kind: output, shape index: {}]  }
   0x1   :  { %14 = vsyncpa [#allocation6], 0  ;;  %s686_s27 = smov [#allocation5]   ;;  %s687_s29 = smov [#allocation3]  }
   0x2   :  { %s37_s28 = sshll.u32 %s686_s27, 4  ;;  %s24_s30 = sshll.u32 %s687_s29, 4  ;;  %s38_s28 = int_to_ptr.vmem [resolvable:$true] %s37_s28  ;;  %s25_s30 = int_to_ptr.vmem [resolvable:$true] %s24_s30 }
   0x3   :  { %s630_s9 = scalar_lea.vmem %s38_s28, 16  ;;  %s634_s10 = scalar_lea.vmem %s38_s28, 32 }
   0x4   :  { %p631_p0 = scmp.ne.s32.totalorder %s38_s28, %s630_s9  ;;  %p635_p1 = scmp.lt.s32.totalorder %s38_s28, %s38_s28 }
   0x5   :  { %p636_p2 = scmp.lt.s32.totalorder %s634_s10, %s630_s9 }
   0x7   :  { %p637_p3 = por %p636_p2, %p635_p1 }
   0x9   :  { %p638_p4 = pnand %p637_p3, %p631_p0 }
   0xb   :  { %641 = shalt.err (!%p638_p4)
}
   0xc   :  { %40 = dma.hbm_to_vmem [thread:$0]  %s824_s3, 16, %s38_s28, [#allocation6]  }
   0xd   :  { %s650_s13 = scalar_lea.vmem %s25_s30, 1024  ;;  %p655_p6 = scmp.lt.s32.totalorder %s25_s30, %s25_s30 }
   0xe   :  { %p651_p5 = scmp.ne.s32.totalorder %s25_s30, %s650_s13  ;;  %p656_p7 = scmp.lt.s32.totalorder %s650_s13, %s650_s13 }
  0x10   :  { %p657_p8 = por %p656_p7, %p655_p6 }
  0x12   :  { %p658_p9 = pnand %p657_p8, %p651_p5 }
  0x14   :  { %661 = shalt.err (!%p658_p9)
}
  0x15   :  { %s688_s14 = smov 64   ;;  %s689_s15 = smov 4  }
  0x16   :  { %30 = dma.hbm_to_vmem [thread:$0]  %s823_s2, 1024, %s25_s30, [#allocation4], %s688_s14, %s688_s14, %s689_s15  }
  0x17   :  { %s690_s18 = smov [#allocation7]  }
  0x18   :  { %s50_s19 = sshll.u32 %s690_s18, 4  ;;  %s51_s19 = int_to_ptr.vmem [resolvable:$true] %s50_s19 }
  0x19   :  { %s670_s20 = scalar_lea.vmem %s51_s19, 2048  ;;  %p675_p11 = scmp.lt.s32.totalorder %s51_s19, %s51_s19 }
  0x1a   :  { %p671_p10 = scmp.ne.s32.totalorder %s51_s19, %s670_s20  ;;  %p676_p12 = scmp.lt.s32.totalorder %s670_s20, %s670_s20 }
  0x1c   :  { %p677_p13 = por %p676_p12, %p675_p11 }
  0x1e   :  { %p678_p0 = pnand %p677_p13, %p671_p10 }
  0x20   :  { %681 = shalt.err (!%p678_p0)
}
  0x21   :  { %s691_s3 = smov 128   ;;  %s692_s21 = smov 8  }
  0x22   :  { %56 = dma.hbm_to_vmem [thread:$0]  %s827_s6, 2048, %s51_s19, [#allocation6], %s691_s3, %s691_s3, %s692_s21  }
  0x23   :  { %682 = dma.done.wait [#allocation4], 1024  }
  0x24   :  { %683 = vsyncadd [#allocation4], 4294966272 }
  0x25   :  { %684 = dma.done.wait [#allocation6], 2064  }
  0x26   :  { %685 = vsyncadd [#allocation6], 4294965232  ;;  %v693_v0 = vmov 0   ;;  %v694_v1 = vmov 0.0   ;;  %v71_v2 = vld [vmem:[%s822_s1] sm:$0xff]  ;;  %v72_v3 = vld [vmem:[%s822_s1 + $0x8] sm:$0xff]  ;;  %v69_v19 = vlaneseq }
  0x27   :  { %604 = vset.pattern.permute.xlu0 %v693_v0  ;;  %519 = vmatprep.subr.bf16.mxu0 %v694_v1  ;;  %v73_v4 = vadd.s32 32, %v71_v2  ;;  %v605_v5 = vld [vmem:[#allocation3 + $0x38] sm:$0xff]   ;;  %v74_v6 = vadd.s32 32, %v72_v3  ;;  %v606_v7 = vld [vmem:[#allocation3 + $0x30] sm:$0xff]   ;;  %v607_v8 = vld [vmem:[#allocation3 + $0x28] sm:$0xff]   ;;  %vm695_vm0 = vmmov 0  }
  0x28   :  { %539 = vmatprep.subr.bf16.mxu1 %v694_v1  ;;  %520 = vmatpush3.bf16.msra.mxu0 %v605_v5  ;;  %v608_v9 = vld [vmem:[#allocation3 + $0x20] sm:$0xff]   ;;  %v609_v10 = vld [vmem:[#allocation3 + $0x18] sm:$0xff]   ;;  %v614_v11 = vld [vmem:[%s825_s4 + $0x38] sm:$0xff]   ;;  %v70_v20 = vand.u32 127, %v69_v19  ;;  %vm105_vm3 = vcmask 257024  }
  0x29   :  { %76 = vperm.xlu0 %604, %v73_v4   ;;  %521 = vmatprep.subr.bf16.mxu0 %v694_v1  ;;  %v610_v12 = vld [vmem:[#allocation3 + $0x10] sm:$0xff]   ;;  %v615_v13 = vld [vmem:[%s825_s4 + $0x30] sm:$0xff]   ;;  %v616_v15 = vld [vmem:[%s825_s4 + $0x28] sm:$0xff]  }
  0x2a   :  { %535 = vmatprep.mubr.msk.bf16.mxu0 %vm695_vm0, %v694_v1  ;;  %555 = vmatprep.mubr.msk.bf16.mxu1 %vm695_vm0, %v694_v1  ;;  %v611_v14 = vld [vmem:[#allocation3 + $0x8] sm:$0xff]   ;;  %v612_v16 = vld [vmem:[#allocation3] sm:$0xff]   ;;  %v617_v17 = vld [vmem:[%s825_s4 + $0x20] sm:$0xff]  }
  0x2b   :  { %540 = vmatpush3.bf16.msra.mxu1 %v614_v11  ;;  %v618_v18 = vld [vmem:[%s825_s4 + $0x18] sm:$0xff]   ;;  %v95_v22 = vld [vmem:[%s821_s0] sm:$0xff]  ;;  %v96_v23 = vld [vmem:[%s821_s0 + $0x8] sm:$0xff] }
  0x2c   :  { %522 = vmatpush3.bf16.msra.mxu0 %v606_v7  ;;  %541 = vmatprep.subr.bf16.mxu1 %v694_v1  ;;  %v478_v26 = vpack.c.bf16 %v95_v22, %v95_v22  ;;  %v479_v27 = vpack.c.bf16 %v96_v23, %v96_v23  ;;  %v619_v31 = vld [vmem:[%s825_s4 + $0x10] sm:$0xff]   ;;  %v620_v32 = vld [vmem:[%s825_s4 + $0x8] sm:$0xff]   ;;  %v621_v33 = vld [vmem:[%s825_s4] sm:$0xff]  }
  0x2d   :  { %79 = vperm.xlu0 %604, %v74_v6   ;;  %523 = vmatprep.subr.bf16.mxu0 %v694_v1  ;;  %v361_v34 = vld [vmem:[#allocation7 + $0x78] sm:$0xff]  ;;  %v360_v35 = vld [vmem:[#allocation7 + $0x70] sm:$0xff]  ;;  %v359_v36 = vld [vmem:[#allocation7 + $0x68] sm:$0xff] }
  0x2e   :  { %v358_v37 = vld [vmem:[#allocation7 + $0x60] sm:$0xff]  ;;  %v357_v38 = vld [vmem:[#allocation7 + $0x58] sm:$0xff]  ;;  %v356_v39 = vld [vmem:[#allocation7 + $0x50] sm:$0xff] }
  0x2f   :  { %542 = vmatpush3.bf16.msra.mxu1 %v615_v13  ;;  %v355_v40 = vld [vmem:[#allocation7 + $0x48] sm:$0xff]  ;;  %v354_v41 = vld [vmem:[#allocation7 + $0x40] sm:$0xff]  ;;  %v353_v42 = vld [vmem:[#allocation7 + $0x38] sm:$0xff] }
  0x30   :  { %524 = vmatpush3.bf16.msra.mxu0 %v607_v8  ;;  %543 = vmatprep.subr.bf16.mxu1 %v694_v1  ;;  %v456_v44 = vld [vmem:[#allocation5] ss:$0 sm:$0xff]  ;;  %v352_v52 = vld [vmem:[#allocation7 + $0x30] sm:$0xff]  ;;  %v351_v53 = vld [vmem:[#allocation7 + $0x28] sm:$0xff] }
  0x31   :  { %525 = vmatprep.subr.bf16.mxu0 %v694_v1  ;;  %v350_v54 = vld [vmem:[#allocation7 + $0x20] sm:$0xff]  ;;  %v349_v55 = vld [vmem:[#allocation7 + $0x18] sm:$0xff]  ;;  %v348_v56 = vld [vmem:[#allocation7 + $0x10] sm:$0xff] }
  0x32   :  { %v347_v57 = vld [vmem:[#allocation7 + $0x8] sm:$0xff]  ;;  %v346_v58 = vld [vmem:[#allocation7] sm:$0xff]  ;;  %v466_v60 = vld [vmem:[%s826_s5] ss:$0 sm:$0xff] }
  0x33   :  { %544 = vmatpush3.bf16.msra.mxu1 %v616_v15  ;;  %v475_v7 = vld [vmem:[%s828_s7] ss:$0 sm:$0xff] }
  0x34   :  { %526 = vmatpush3.bf16.msra.mxu0 %v608_v9  ;;  %545 = vmatprep.subr.bf16.mxu1 %v694_v1 }
  0x35   :  { %527 = vmatprep.subr.bf16.mxu0 %v694_v1 }
  0x37   :  { %546 = vmatpush3.bf16.msra.mxu1 %v617_v17 }
  0x38   :  { %528 = vmatpush3.bf16.msra.mxu0 %v609_v10  ;;  %547 = vmatprep.subr.bf16.mxu1 %v694_v1 }
  0x39   :  { %529 = vmatprep.subr.bf16.mxu0 %v694_v1 }
  0x3b   :  { %548 = vmatpush3.bf16.msra.mxu1 %v618_v18 }
  0x3c   :  { %530 = vmatpush3.bf16.msra.mxu0 %v610_v12  ;;  %549 = vmatprep.subr.bf16.mxu1 %v694_v1 }
  0x3d   :  { %531 = vmatprep.subr.bf16.mxu0 %v694_v1 }
  0x3f   :  { %550 = vmatpush3.bf16.msra.mxu1 %v619_v31 }
  0x40   :  { %532 = vmatpush3.bf16.msra.mxu0 %v611_v14  ;;  %551 = vmatprep.subr.bf16.mxu1 %v694_v1 }
  0x41   :  { %533 = vmatprep.subr.bf16.mxu0 %v694_v1 }
  0x43   :  { %552 = vmatpush3.bf16.msra.mxu1 %v620_v32 }
  0x44   :  { %534 = vmatpush3.bf16.msra.mxu0 %v612_v16  ;;  %553 = vmatprep.subr.bf16.mxu1 %v694_v1 }
  0x45   :  { %559 = vmatprep.subr.mxu0 %v361_v34 }
  0x47   :  { %554 = vmatpush3.bf16.msra.mxu1 %v621_v33 }
  0xa4   :  { %v77_v21 = vpop.permute.xlu0 %76 }
  0xa5   :  { %vm81_vm1 = vcmp.eq.s32.totalorder %v70_v20, %v77_v21 }
  0xa6   :  { %v83_v25 = vsel %vm81_vm1, 1.0, %v694_v1 }
  0xa8   :  { %v80_v24 = vpop.permute.xlu0 %79 }
  0xa9   :  { %vm82_vm2 = vcmp.eq.s32.totalorder %v70_v20, %v80_v24 }
  0xaa   :  { %v84_v28 = vsel %vm82_vm2, 1.0, %v694_v1 }
  0xab   :  { %v481_v29 = vpack.c.bf16 %v84_v28, %v83_v25 }
  0xad   :  { %482 = vst [vmem:[#allocation2] sm:$0xff] %v481_v29  }
  0xae   :  { %106 = vst.msk [vmem:[#allocation2] sm:$0xf] %vm105_vm3, %v478_v26  ;;  %107 = vst.msk [vmem:[#allocation2 + $0x4] sm:$0xf] %vm105_vm3, %v479_v27 }
  0xb5   :  { %v613_v30 = vld [vmem:[#allocation2] sm:$0xff]  }
  0xb6   :  { %536 = vmatmul.mubr.bf16.vlgmr.msra.gmra.mxu0 %v613_v30 }
  0xb7   :  { %560 = vmatpush3.msra.mxu0 %v361_v34 }
  0xb8   :  { %561 = vmatprep.subr.mxu0 %v360_v35 }
  0xb9   :  { %562 = vmatpush3.msra.mxu0 %v360_v35 }
  0xba   :  { %563 = vmatprep.subr.mxu0 %v359_v36 }
  0xbb   :  { %564 = vmatpush3.msra.mxu0 %v359_v36 }
  0xbc   :  { %565 = vmatprep.subr.mxu0 %v358_v37 }
  0xbd   :  { %566 = vmatpush3.msra.mxu0 %v358_v37 }
  0xbe   :  { %567 = vmatprep.subr.mxu0 %v357_v38 }
  0xbf   :  { %568 = vmatpush3.msra.mxu0 %v357_v38 }
  0xc0   :  { %569 = vmatprep.subr.mxu0 %v356_v39 }
  0xc1   :  { %570 = vmatpush3.msra.mxu0 %v356_v39 }
  0xc2   :  { %571 = vmatprep.subr.mxu0 %v355_v40 }
  0xc3   :  { %572 = vmatpush3.msra.mxu0 %v355_v40 }
  0xc4   :  { %573 = vmatprep.subr.mxu0 %v354_v41 }
  0xc5   :  { %574 = vmatpush3.msra.mxu0 %v354_v41 }
  0xc6   :  { %575 = vmatprep.subr.mxu0 %v353_v42 }
  0xc7   :  { %576 = vmatpush3.msra.mxu0 %v353_v42 }
  0xc8   :  { %577 = vmatprep.subr.mxu0 %v352_v52 }
  0xc9   :  { %578 = vmatpush3.msra.mxu0 %v352_v52 }
  0xca   :  { %579 = vmatprep.subr.mxu0 %v351_v53 }
  0xcb   :  { %580 = vmatpush3.msra.mxu0 %v351_v53 }
  0xcc   :  { %581 = vmatprep.subr.mxu0 %v350_v54 }
  0xcd   :  { %582 = vmatpush3.msra.mxu0 %v350_v54 }
  0xce   :  { %583 = vmatprep.subr.mxu0 %v349_v55 }
  0xcf   :  { %584 = vmatpush3.msra.mxu0 %v349_v55 }
  0xd0   :  { %585 = vmatprep.subr.mxu0 %v348_v56 }
  0xd1   :  { %586 = vmatpush3.msra.mxu0 %v348_v56 }
  0xd2   :  { %587 = vmatprep.subr.mxu0 %v347_v57 }
  0xd3   :  { %588 = vmatpush3.msra.mxu0 %v347_v57 }
  0xd4   :  { %589 = vmatprep.subr.mxu0 %v346_v58 }
  0xd5   :  { %590 = vmatpush3.msra.mxu0 %v346_v58 }
 0x176   :  { %v221_v43 = vpop.f32.mrf.mxu0 }
 0x177   :  { %v222_v47 = vadd.f32 %v456_v44, %v221_v43 }
 0x178   :  { %v537_v45 = vpop.f32.mrf.mxu0 }
 0x17a   :  { %v224_v46 = vpop.f32.mrf.mxu0 }
 0x17b   :  { %v225_v48 = vadd.f32 %v456_v44, %v224_v46 }
 0x17c   :  { %v538_v49 = vpop.f32.mrf.mxu0 }
 0x17d   :  { %v228_v50 = vpack.c.bf16 %v225_v48, %v222_v47 }
 0x17f   :  { %v229_v51 = vmax.bf16 %v693_v0, %v228_v50 }
 0x181   :  { %556 = vmatmul.mubr.bf16.vlgmr.msra.gmra.mxu1 %v229_v51 }
 0x241   :  { %v335_v59 = vpop.f32.mrf.mxu1 }
 0x242   :  { %v336_v63 = vadd.f32 %v466_v60, %v335_v59 }
 0x243   :  { %v557_v61 = vpop.f32.mrf.mxu1 }
 0x245   :  { %v338_v62 = vpop.f32.mrf.mxu1 }
 0x246   :  { %v339_v1 = vadd.f32 %v466_v60, %v338_v62 }
 0x247   :  { %v558_v2 = vpop.f32.mrf.mxu1 }
 0x248   :  { %v342_v3 = vpack.c.bf16 %v339_v1, %v336_v63 }
 0x24a   :  { %v343_v4 = vmax.bf16 %v693_v0, %v342_v3 }
 0x24c   :  { %v345_v5 = vunpack.c.h.bf16 %v343_v4  ;;  %v344_v6 = vunpack.c.l.bf16 %v343_v4 }
 0x24e   :  { %591 = vmatprep.mubr.f32.mxu0 %v344_v6 }
 0x24f   :  { %592 = vmatmul.mubr.f32.vlgmr.msra.gmra.mxu0 %v345_v5 }
 0x30f   :  { %v593_v8 = vpop.f32.mrf.mxu0 }
 0x310   :  { %v441_v9 = vadd.f32 %v593_v8, %v475_v7 }
 0x311   :  { %v435_v10 = vpop.f32.mrf.mxu0 }
 0x312   :  { %445 = vst [vmem:[%s829_s8 + $0x8] sm:$0xff] %v441_v9  ;;  %v436_v11 = vadd.f32 %v475_v7, %v435_v10 }
 0x314   :  { %444 = vst [vmem:[%s829_s8] sm:$0xff] %v436_v11 }
 0x315   :  { %450 = vsyncpa [#allocation4], 1 }
 0x316   :  { %451 = vsyncpa [#allocation6], 1 }

</bundles_post_ra>
